<compile_context>
chip_gen: v7x
topology: tpu7x:2x2x1
jax: 0.10.0
libtpu: 0.0.40
codegen_flags: <defaults>
</compile_context>

<pallas_src>
import jax
import jax.numpy as jnp
from jax.experimental import pallas as pl
from jax.experimental.pallas import tpu as pltpu


def memory_read_kernel(q_ref, m_ref,
                       wqt_ref, wub_ref, bpre_ref,   # folded W_att / U_att / (bq+bu)
                       wwb_ref,                      # block-diag w_att
                       rexp_ref,                     # p -> lane expansion matrix
                       wcs_ref, wcq_ref, bc_ref,     # W_cat (ctx part stacked, q part, bias)
                       out_ref):
    f32 = jnp.float32
    wdt = wqt_ref.dtype                      # compute dtype for MXU operands
    q = q_ref[...]                           # [tn, Qe]
    m = m_ref[...]                           # [tn, Nm*Me]  (lane-dense memory features)

    # Pre-tanh attention projection, directly lane-dense [tn, Nm*P]:
    #   pre[i, n*P+k] = (W_att q_i)[k] + (U_att m_{i,n})[k] + (bq + bu)[k]
    pre = (jnp.dot(q, wqt_ref[...], preferred_element_type=f32)
           + jnp.dot(m, wub_ref[...], preferred_element_type=f32)
           + bpre_ref[...])
    t = jnp.tanh(pre)                        # [tn, Nm*P], f32 on the EUP/VPU

    # Attention logits [tn, Nm] via block-diagonal w_att (w_att bias dropped:
    # a constant shift does not change the softmax).
    logits = jnp.dot(t.astype(wdt), wwb_ref[...], preferred_element_type=f32)

    # Softmax over memory nodes; divide -> EUP approx reciprocal.
    mx = jnp.max(logits, axis=-1, keepdims=True)
    e = jnp.exp(logits - mx)
    p = e * pl.reciprocal(jnp.sum(e, axis=-1, keepdims=True), approx=True)  # [tn, Nm]

    # Context + W_cat entirely on the MXU:
    #   p_exp[i, n*Me+j] = p[i, n]
    #   out = (p_exp * m) @ stack(W_cat_ctx) + q @ W_cat_q + bc
    p_exp = jnp.dot(p.astype(wdt), rexp_ref[...], preferred_element_type=f32)  # [tn, Nm*Me]
    weighted = (p_exp * m.astype(f32)).astype(wdt)
    out = (jnp.dot(weighted, wcs_ref[...], preferred_element_type=f32)
           + jnp.dot(q, wcq_ref[...], preferred_element_type=f32)
           + bc_ref[...])
    out_ref[...] = jnp.maximum(out, 0.0).astype(out_ref.dtype)


def _prepare_weights(params, Nm, dtype):
    """Fold the Linear weights into lane-dense / block-diagonal forms (host side)."""
    wq, bq, wu, bu, ww, bw, wc_ctx, wc_q, bc = params
    Me = wu.shape[0]
    eye = jnp.eye(Nm, dtype=jnp.float32)
    wq_t = jnp.tile(wq, (1, Nm))                              # [Qe, Nm*P]
    wu_blk = jnp.kron(eye, wu)                                # [Nm*Me, Nm*P]
    b_pre = jnp.tile(bq + bu, (1, Nm))                        # [1, Nm*P]
    ww_blk = jnp.kron(eye, ww)                                # [Nm*P, Nm]
    r_exp = jnp.kron(eye, jnp.ones((1, Me), jnp.float32))     # [Nm, Nm*Me]
    wc_stack = jnp.tile(wc_ctx, (Nm, 1))                      # [Nm*Me, Qe]
    cast = lambda x: x.astype(dtype)
    return (cast(wq_t), cast(wu_blk), b_pre.astype(jnp.float32), cast(ww_blk),
            cast(r_exp), cast(wc_stack), cast(wc_q), bc.astype(jnp.float32))


def _pick_tn(N, Nm, Me, itemsize, block_bytes=4 << 20):
    """Largest row tile that divides N, is a multiple of 8 (or == N), and whose
    memory-feature block stays <= block_bytes (double-buffered it fits every
    generation's default scoped VMEM, incl. v7x's tighter 64 MiB physical)."""
    cap = max(8, block_bytes // max(1, Nm * Me * itemsize))
    if N <= cap:
        return N
    best = None
    d = 8
    while d <= cap:
        if N % d == 0:
            best = d
        d += 8
    return best if best is not None else N


def memory_read(query_h, memory_h, params, *, tn=None, dtype=jnp.float32):
    """query_h: [N, Qe], memory_h: [N, Nm, Me] -> next query vectors [N, Qe].

    The torch module's broadcast (query.unsqueeze(1) + U_att(memory)) requires
    #memory_graphs == #query_nodes, hence memory_h's leading dim equals N.
    """
    N, Qe = query_h.shape
    Nq, Nm, Me = memory_h.shape
    assert Nq == N
    P = params[0].shape[1]

    (wq_t, wu_blk, b_pre, ww_blk,
     r_exp, wc_stack, wc_q, bc) = _prepare_weights(params, Nm, dtype)

    q = query_h.astype(dtype)
    m = memory_h.reshape(N, Nm * Me).astype(dtype)   # contiguous, lane-dense

    if tn is None:
        tn = _pick_tn(N, Nm, Me, jnp.dtype(dtype).itemsize)
    assert N % tn == 0 and (tn == N or tn % 8 == 0)

    full = lambda i: (0, 0)
    return pl.pallas_call(
        memory_read_kernel,
        out_shape=jax.ShapeDtypeStruct((N, Qe), query_h.dtype),
        grid_spec=pltpu.PrefetchScalarGridSpec(
            num_scalar_prefetch=0,
            grid=(N // tn,),
            in_specs=[
                pl.BlockSpec((tn, Qe), lambda i: (i, 0)),       # query features
                pl.BlockSpec((tn, Nm * Me), lambda i: (i, 0)),  # memory features (dense)
                pl.BlockSpec((Qe, Nm * P), full),               # lane-tiled W_att
                pl.BlockSpec((Nm * Me, Nm * P), full),          # block-diag U_att
                pl.BlockSpec((1, Nm * P), full),                # folded bq + bu
                pl.BlockSpec((Nm * P, Nm), full),               # block-diag w_att
                pl.BlockSpec((Nm, Nm * Me), full),              # p -> lane expansion
                pl.BlockSpec((Nm * Me, Qe), full),              # stacked W_cat (ctx part)
                pl.BlockSpec((Qe, Qe), full),                   # W_cat (query part)
                pl.BlockSpec((1, Qe), full),                    # W_cat bias
            ],
            out_specs=pl.BlockSpec((tn, Qe), lambda i: (i, 0)),
        ),
        compiler_params=pltpu.CompilerParams(
            dimension_semantics=("parallel",)),
    )(q, m, wq_t, wu_blk, b_pre, ww_blk, r_exp, wc_stack, wc_q, bc)


def reference(query_h, memory_h, params):
    wq, bq, wu, bu, ww, bw, wc_ctx, wc_q, bc = params
    qa = query_h @ wq + bq                                     # [N, P]
    ma = memory_h @ wu + bu                                    # [N, Nm, P]
    logits = (jnp.tanh(qa[:, None, :] + ma) @ ww)[..., 0] + bw[0, 0]
    p = jax.nn.softmax(logits, axis=-1)                        # [N, Nm]
    ctx = jnp.sum(p[:, :, None] * memory_h, axis=1)            # [N, Me]
    out = ctx @ wc_ctx + query_h @ wc_q + bc
    return jnp.maximum(out, 0.0)


if __name__ == "__main__":
    # Small, module-consistent shapes.
    N, Nm = 16, 8            # query nodes == number of memory graphs; nodes/memory graph
    Qe, Me, P = 32, 64, 16   # query_embed, memory_embed, att_proj

    key = jax.random.PRNGKey(0)
    ks = jax.random.split(key, 11)
    scale = 0.1
    query_h = jax.random.normal(ks[0], (N, Qe), jnp.float32)
    memory_h = jax.random.normal(ks[1], (N, Nm, Me), jnp.float32)

    # Deterministic "Linear" parameters (stored pre-transposed: [in, out]).
    wq = scale * jax.random.normal(ks[2], (Qe, P), jnp.float32)
    bq = scale * jax.random.normal(ks[3], (1, P), jnp.float32)
    wu = scale * jax.random.normal(ks[4], (Me, P), jnp.float32)
    bu = scale * jax.random.normal(ks[5], (1, P), jnp.float32)
    ww = scale * jax.random.normal(ks[6], (P, 1), jnp.float32)
    bw = scale * jax.random.normal(ks[7], (1, 1), jnp.float32)
    # W_cat acts on concat([context(Me), query(Qe)]) -> split into two blocks.
    wc_ctx = scale * jax.random.normal(ks[8], (Me, Qe), jnp.float32)
    wc_q = scale * jax.random.normal(ks[9], (Qe, Qe), jnp.float32)
    bc = scale * jax.random.normal(ks[10], (1, Qe), jnp.float32)

    params = (wq, bq, wu, bu, ww, bw, wc_ctx, wc_q, bc)
    ref = reference(query_h, memory_h, params)

    # f32 path (default).
    out = jax.block_until_ready(memory_read(query_h, memory_h, params))
    assert out.shape == (N, Qe)
    assert jnp.allclose(out, ref, atol=2e-2, rtol=2e-2), "f32 mismatch vs reference"

    # bf16 activation/weight path (HBM-bound regime on v6e/v7x); f32 accumulation.
    out_bf16 = jax.block_until_ready(
        memory_read(query_h, memory_h, params, dtype=jnp.bfloat16))
    assert jnp.allclose(out_bf16, ref, atol=1.5e-1, rtol=1.5e-1), "bf16 mismatch vs reference"

    print("KERNEL_OK")
</pallas_src>

<mosaic_0001>
module attributes {stable_mosaic.version = 11 : i64} {
  func.func @memory_read_kernel(%arg0: i32, %arg1: memref<16x32xf32, #tpu.memory_space<vmem>>, %arg2: memref<16x512xf32, #tpu.memory_space<vmem>>, %arg3: memref<32x128xf32, #tpu.memory_space<vmem>>, %arg4: memref<512x128xf32, #tpu.memory_space<vmem>>, %arg5: memref<1x128xf32, #tpu.memory_space<vmem>>, %arg6: memref<128x8xf32, #tpu.memory_space<vmem>>, %arg7: memref<8x512xf32, #tpu.memory_space<vmem>>, %arg8: memref<512x32xf32, #tpu.memory_space<vmem>>, %arg9: memref<32x32xf32, #tpu.memory_space<vmem>>, %arg10: memref<1x32xf32, #tpu.memory_space<vmem>>, %arg11: memref<16x32xf32, #tpu.memory_space<vmem>>) attributes {dimension_semantics = [#tpu.dimension_semantics<parallel>], iteration_bounds = array<i64: 1>, scalar_prefetch = 0 : i64, scratch_operands = 0 : i64, tpu.core_type = #tpu.core_type<tc>, window_params = [{transform_indices = @transform_0, window_bounds = array<i64: 16, 32>}, {transform_indices = @transform_1, window_bounds = array<i64: 16, 512>}, {pipeline_mode = #tpu.pipeline_mode<synchronous>, transform_indices = @transform_2, window_bounds = array<i64: 32, 128>}, {pipeline_mode = #tpu.pipeline_mode<synchronous>, transform_indices = @transform_3, window_bounds = array<i64: 512, 128>}, {pipeline_mode = #tpu.pipeline_mode<synchronous>, transform_indices = @transform_4, window_bounds = array<i64: 1, 128>}, {pipeline_mode = #tpu.pipeline_mode<synchronous>, transform_indices = @transform_5, window_bounds = array<i64: 128, 8>}, {pipeline_mode = #tpu.pipeline_mode<synchronous>, transform_indices = @transform_6, window_bounds = array<i64: 8, 512>}, {pipeline_mode = #tpu.pipeline_mode<synchronous>, transform_indices = @transform_7, window_bounds = array<i64: 512, 32>}, {pipeline_mode = #tpu.pipeline_mode<synchronous>, transform_indices = @transform_8, window_bounds = array<i64: 32, 32>}, {pipeline_mode = #tpu.pipeline_mode<synchronous>, transform_indices = @transform_9, window_bounds = array<i64: 1, 32>}, {transform_indices = @transform_10, window_bounds = array<i64: 16, 32>}]} {
    %c0 = arith.constant 0 : index
    %c0_0 = arith.constant 0 : index
    %0 = vector.load %arg1[%c0, %c0_0] : memref<16x32xf32, #tpu.memory_space<vmem>>, vector<16x32xf32>
    %c0_1 = arith.constant 0 : index
    %c0_2 = arith.constant 0 : index
    %1 = vector.load %arg2[%c0_1, %c0_2] : memref<16x512xf32, #tpu.memory_space<vmem>>, vector<16x512xf32>
    %c0_3 = arith.constant 0 : index
    %c0_4 = arith.constant 0 : index
    %2 = vector.load %arg3[%c0_3, %c0_4] : memref<32x128xf32, #tpu.memory_space<vmem>>, vector<32x128xf32>
    %cst = arith.constant dense<0.000000e+00> : vector<16x128xf32>
    %3 = tpu.matmul %0, %2, %cst {dimension_numbers = #tpu.dot_dimension_numbers<[1], [0], [0], [1], [0, 0, 1, 1], [], []>} : vector<16x32xf32>, vector<32x128xf32>, vector<16x128xf32> -> vector<16x128xf32>
    %c0_5 = arith.constant 0 : index
    %c0_6 = arith.constant 0 : index
    %4 = vector.load %arg4[%c0_5, %c0_6] : memref<512x128xf32, #tpu.memory_space<vmem>>, vector<512x128xf32>
    %cst_7 = arith.constant dense<0.000000e+00> : vector<16x128xf32>
    %5 = tpu.matmul %1, %4, %cst_7 {dimension_numbers = #tpu.dot_dimension_numbers<[1], [0], [0], [1], [0, 0, 1, 1], [], []>} : vector<16x512xf32>, vector<512x128xf32>, vector<16x128xf32> -> vector<16x128xf32>
    %6 = arith.addf %3, %5 : vector<16x128xf32>
    %c0_8 = arith.constant 0 : index
    %c0_9 = arith.constant 0 : index
    %7 = vector.load %arg5[%c0_8, %c0_9] : memref<1x128xf32, #tpu.memory_space<vmem>>, vector<1x128xf32>
    %8 = vector.broadcast %7 : vector<1x128xf32> to vector<16x128xf32>
    %9 = arith.addf %6, %8 : vector<16x128xf32>
    %10 = math.tanh %9 : vector<16x128xf32>
    %c0_10 = arith.constant 0 : index
    %c0_11 = arith.constant 0 : index
    %11 = vector.load %arg6[%c0_10, %c0_11] : memref<128x8xf32, #tpu.memory_space<vmem>>, vector<128x8xf32>
    %cst_12 = arith.constant dense<0.000000e+00> : vector<16x8xf32>
    %12 = tpu.matmul %10, %11, %cst_12 {dimension_numbers = #tpu.dot_dimension_numbers<[1], [0], [0], [1], [0, 0, 1, 1], [], []>} : vector<16x128xf32>, vector<128x8xf32>, vector<16x8xf32> -> vector<16x8xf32>
    %cst_13 = arith.constant dense<0xFF800000> : vector<16xf32>
    %13 = vector.multi_reduction <maximumf>, %12, %cst_13 [1] : vector<16x8xf32> to vector<16xf32>
    %14 = vector.shape_cast %13 : vector<16xf32> to vector<16x1xf32>
    %15 = vector.broadcast %14 : vector<16x1xf32> to vector<16x8xf32>
    %16 = arith.subf %12, %15 : vector<16x8xf32>
    %17 = math.exp %16 : vector<16x8xf32>
    %cst_14 = arith.constant dense<0.000000e+00> : vector<16xf32>
    %18 = vector.multi_reduction <add>, %17, %cst_14 [1] : vector<16x8xf32> to vector<16xf32>
    %19 = vector.shape_cast %18 : vector<16xf32> to vector<16x1xf32>
    %20 = tpu.reciprocal %19 {approx = true} : vector<16x1xf32> -> vector<16x1xf32>
    %21 = vector.broadcast %20 : vector<16x1xf32> to vector<16x8xf32>
    %22 = arith.mulf %17, %21 : vector<16x8xf32>
    %c0_15 = arith.constant 0 : index
    %c0_16 = arith.constant 0 : index
    %23 = vector.load %arg7[%c0_15, %c0_16] : memref<8x512xf32, #tpu.memory_space<vmem>>, vector<8x512xf32>
    %cst_17 = arith.constant dense<0.000000e+00> : vector<16x512xf32>
    %24 = tpu.matmul %22, %23, %cst_17 {dimension_numbers = #tpu.dot_dimension_numbers<[1], [0], [0], [1], [0, 0, 1, 1], [], []>} : vector<16x8xf32>, vector<8x512xf32>, vector<16x512xf32> -> vector<16x512xf32>
    %25 = arith.mulf %24, %1 : vector<16x512xf32>
    %c0_18 = arith.constant 0 : index
    %c0_19 = arith.constant 0 : index
    %26 = vector.load %arg8[%c0_18, %c0_19] : memref<512x32xf32, #tpu.memory_space<vmem>>, vector<512x32xf32>
    %cst_20 = arith.constant dense<0.000000e+00> : vector<16x32xf32>
    %27 = tpu.matmul %25, %26, %cst_20 {dimension_numbers = #tpu.dot_dimension_numbers<[1], [0], [0], [1], [0, 0, 1, 1], [], []>} : vector<16x512xf32>, vector<512x32xf32>, vector<16x32xf32> -> vector<16x32xf32>
    %c0_21 = arith.constant 0 : index
    %c0_22 = arith.constant 0 : index
    %28 = vector.load %arg9[%c0_21, %c0_22] : memref<32x32xf32, #tpu.memory_space<vmem>>, vector<32x32xf32>
    %cst_23 = arith.constant dense<0.000000e+00> : vector<16x32xf32>
    %29 = tpu.matmul %0, %28, %cst_23 {dimension_numbers = #tpu.dot_dimension_numbers<[1], [0], [0], [1], [0, 0, 1, 1], [], []>} : vector<16x32xf32>, vector<32x32xf32>, vector<16x32xf32> -> vector<16x32xf32>
    %30 = arith.addf %27, %29 : vector<16x32xf32>
    %c0_24 = arith.constant 0 : index
    %c0_25 = arith.constant 0 : index
    %31 = vector.load %arg10[%c0_24, %c0_25] : memref<1x32xf32, #tpu.memory_space<vmem>>, vector<1x32xf32>
    %32 = vector.broadcast %31 : vector<1x32xf32> to vector<16x32xf32>
    %33 = arith.addf %30, %32 : vector<16x32xf32>
    %cst_26 = arith.constant 0.000000e+00 : f32
    %34 = vector.broadcast %cst_26 : f32 to vector<16x32xf32>
    %35 = arith.maximumf %33, %34 : vector<16x32xf32>
    %c0_27 = arith.constant 0 : index
    %c0_28 = arith.constant 0 : index
    %36 = vector.load %arg11[%c0_27, %c0_28] : memref<16x32xf32, #tpu.memory_space<vmem>>, vector<16x32xf32>
    tpu.vector_store %arg11[%c0_27, %c0_28], %35 {strides = array<i32>} : memref<16x32xf32, #tpu.memory_space<vmem>>, vector<16x32xf32>,
    return
  }
  func.func @transform_0(%arg0: i32) -> (i32, i32) {
    %c0_i32 = arith.constant 0 : i32
    %c0_i32_0 = arith.constant 0 : i32
    return %arg0, %c0_i32 : i32, i32
  }
  func.func @transform_1(%arg0: i32) -> (i32, i32) {
    %c0_i32 = arith.constant 0 : i32
    %c0_i32_0 = arith.constant 0 : i32
    return %arg0, %c0_i32 : i32, i32
  }
  func.func @transform_2(%arg0: i32) -> (i32, i32) {
    %c0_i32 = arith.constant 0 : i32
    %c0_i32_0 = arith.constant 0 : i32
    %c0_i32_1 = arith.constant 0 : i32
    return %c0_i32, %c0_i32_0 : i32, i32
  }
  func.func @transform_3(%arg0: i32) -> (i32, i32) {
    %c0_i32 = arith.constant 0 : i32
    %c0_i32_0 = arith.constant 0 : i32
    %c0_i32_1 = arith.constant 0 : i32
    return %c0_i32, %c0_i32_0 : i32, i32
  }
  func.func @transform_4(%arg0: i32) -> (i32, i32) {
    %c0_i32 = arith.constant 0 : i32
    %c0_i32_0 = arith.constant 0 : i32
    %c0_i32_1 = arith.constant 0 : i32
    return %c0_i32, %c0_i32_0 : i32, i32
  }
  func.func @transform_5(%arg0: i32) -> (i32, i32) {
    %c0_i32 = arith.constant 0 : i32
    %c0_i32_0 = arith.constant 0 : i32
    %c0_i32_1 = arith.constant 0 : i32
    return %c0_i32, %c0_i32_0 : i32, i32
  }
  func.func @transform_6(%arg0: i32) -> (i32, i32) {
    %c0_i32 = arith.constant 0 : i32
    %c0_i32_0 = arith.constant 0 : i32
    %c0_i32_1 = arith.constant 0 : i32
    return %c0_i32, %c0_i32_0 : i32, i32
  }
  func.func @transform_7(%arg0: i32) -> (i32, i32) {
    %c0_i32 = arith.constant 0 : i32
    %c0_i32_0 = arith.constant 0 : i32
    %c0_i32_1 = arith.constant 0 : i32
    return %c0_i32, %c0_i32_0 : i32, i32
  }
  func.func @transform_8(%arg0: i32) -> (i32, i32) {
    %c0_i32 = arith.constant 0 : i32
    %c0_i32_0 = arith.constant 0 : i32
    %c0_i32_1 = arith.constant 0 : i32
    return %c0_i32, %c0_i32_0 : i32, i32
  }
  func.func @transform_9(%arg0: i32) -> (i32, i32) {
    %c0_i32 = arith.constant 0 : i32
    %c0_i32_0 = arith.constant 0 : i32
    %c0_i32_1 = arith.constant 0 : i32
    return %c0_i32, %c0_i32_0 : i32, i32
  }
  func.func @transform_10(%arg0: i32) -> (i32, i32) {
    %c0_i32 = arith.constant 0 : i32
    %c0_i32_0 = arith.constant 0 : i32
    return %arg0, %c0_i32 : i32, i32
  }
}

</mosaic_0001>

<bundles_post_ra>
// kernel: tpu_custom_call.1
= control target key start
LH: loop header
LB: loop body
LE: loop exit
PB: predicated region body
PF: predicated region fallthrough
CT: control target
= control target key end

     0   :  { %15 = vsyncpa [#allocation3], 0  ;;  %s2120_s0 = inlined_call_operand.hbm [shape: f32[16,32], index: 0, kind: input, shape index: {}]   ;;  %s2121_s1 = inlined_call_operand.vmem [shape: f32[16,512], index: 1, kind: input, shape index: {}]   ;;  %s2122_s2 = inlined_call_operand.vmem [shape: f32[32,128], index: 2, kind: input, shape index: {}]   ;;  %s2123_s3 = inlined_call_operand.vmem [shape: f32[512,128], index: 3, kind: input, shape index: {}]   ;;  %s2124_s4 = inlined_call_operand.vmem [shape: f32[1,128], index: 4, kind: input, shape index: {}]   ;;  %s2125_s5 = inlined_call_operand.vmem [shape: f32[128,8], index: 5, kind: input, shape index: {}]   ;;  %s2126_s6 = inlined_call_operand.vmem [shape: f32[8,512], index: 6, kind: input, shape index: {}]   ;;  %s2127_s7 = inlined_call_operand.vmem [shape: f32[512,32], index: 7, kind: input, shape index: {}]   ;;  %s2128_s8 = inlined_call_operand.vmem [shape: f32[32,32], index: 8, kind: input, shape index: {}]   ;;  %s2129_s9 = inlined_call_operand.vmem [shape: f32[1,32], index: 9, kind: input, shape index: {}]   ;;  %s2130_s10 = inlined_call_operand.hbm [shape: f32[16,32], index: 10, kind: output, shape index: {}]  }
   0x1   :  { %16 = vsyncpa [#allocation4], 0  ;;  %s1470_s13 = smov [#allocation2]   ;;  %s1422_s17 = scalar_lea.hbm %s2120_s0, 256 }
   0x2   :  { %s22_s14 = sshll.u32 %s1470_s13, 4  ;;  %p1423_p0 = scmp.ne.s32.totalorder %s2120_s0, %s1422_s17  ;;  %s23_s14 = int_to_ptr.vmem [resolvable:$true] %s22_s14 }
   0x3   :  { %p1426_p1 = scmp.lt.u32.totalorder %s1422_s17, %s2120_s0 }
   0x5   :  { %p1428_p2 = pnand %p1426_p1, %p1423_p0 }
   0x7   :  { %1431 = shalt.err (!%p1428_p2)
}
   0x8   :  { %s1432_s22 = scalar_lea.vmem %s23_s14, 256  ;;  %p1437_p4 = scmp.lt.s32.totalorder %s23_s14, %s23_s14 }
   0x9   :  { %p1433_p3 = scmp.ne.s32.totalorder %s23_s14, %s1432_s22  ;;  %p1438_p5 = scmp.lt.s32.totalorder %s1432_s22, %s1432_s22 }
   0xb   :  { %p1439_p6 = por %p1438_p5, %p1437_p4 }
   0xd   :  { %p1440_p7 = pnand %p1439_p6, %p1433_p3 }
   0xf   :  { %1443 = shalt.err (!%p1440_p7)
}
  0x10   :  { %s1471_s23 = smov 128   ;;  %s1472_s24 = smov 8  }
  0x11   :  { %28 = dma.hbm_to_vmem [thread:$0]  %s2120_s0, 256, %s23_s14, [#allocation3], %s1471_s23, %s1471_s23, %s1472_s24  }
  0x12   :  { %1466 = dma.done.wait [#allocation3], 256  }
  0x13   :  { %1467 = vsyncadd [#allocation3], 4294967040  ;;  %v80_v0 = vld [vmem:[%s2123_s3 + $0x80] sm:$0xff]  ;;  %v81_v1 = vld [vmem:[%s2123_s3 + $0x88] sm:$0xff]  ;;  %vm278_vm0 = vcmask 261120   ;;  %vm462_vm1 = vcmask 64512  }
  0x14   :  { %v112_v2 = vld [vmem:[%s2123_s3 + $0x180] sm:$0xff]  ;;  %v1229_v3 = vpack.c.bf16 %v81_v1, %v80_v0  ;;  %v113_v4 = vld [vmem:[%s2123_s3 + $0x188] sm:$0xff]  ;;  %v82_v11 = vld [vmem:[%s2123_s3 + $0x90] sm:$0xff]  ;;  %s1474_s30 = smov [#allocation5]  }
  0x15   :  { %v64_v5 = vld [vmem:[%s2123_s3] sm:$0xff]  ;;  %v65_v6 = vld [vmem:[%s2123_s3 + $0x8] sm:$0xff]  ;;  %v1261_v7 = vpack.c.bf16 %v113_v4, %v112_v2  ;;  %v83_v13 = vld [vmem:[%s2123_s3 + $0x98] sm:$0xff]  ;;  %s968_s11 = sshll.u32 %s1474_s30, 4  ;;  %s969_s11 = int_to_ptr.vmem [resolvable:$true] %s968_s11 }
  0x16   :  { %v1231_v8 = vpack.c.bf16 %v65_v6, %v64_v5  ;;  %v96_v9 = vld [vmem:[%s2123_s3 + $0x100] sm:$0xff]  ;;  %v97_v10 = vld [vmem:[%s2123_s3 + $0x108] sm:$0xff]  ;;  %1230 = vmatprep.subr.bf16.mxu0 %v1229_v3  ;;  %v114_v14 = vld [vmem:[%s2123_s3 + $0x190] sm:$0xff]  ;;  %v1233_v16 = vpack.c.bf16 %v83_v13, %v82_v11  ;;  %s1444_s12 = scalar_lea.vmem %s969_s11, 256  ;;  %p1449_p9 = scmp.lt.s32.totalorder %s969_s11, %s969_s11 }
  0x17   :  { %v1263_v12 = vpack.c.bf16 %v97_v10, %v96_v9  ;;  %v115_v15 = vld [vmem:[%s2123_s3 + $0x198] sm:$0xff]  ;;  %1262 = vmatprep.subr.bf16.mxu1 %v1261_v7  ;;  %v66_v18 = vld [vmem:[%s2123_s3 + $0x10] sm:$0xff]  ;;  %v84_v23 = vld [vmem:[%s2123_s3 + $0xa0] sm:$0xff]  ;;  %p1445_p8 = scmp.ne.s32.totalorder %s969_s11, %s1444_s12  ;;  %p1450_p10 = scmp.lt.s32.totalorder %s1444_s12, %s1444_s12 }
  0x18   :  { %1232 = vmatpush3.bf16.msra.mxu0 %v1231_v8  ;;  %v1265_v17 = vpack.c.bf16 %v115_v15, %v114_v14  ;;  %v67_v19 = vld [vmem:[%s2123_s3 + $0x18] sm:$0xff]  ;;  %v98_v20 = vld [vmem:[%s2123_s3 + $0x110] sm:$0xff]  ;;  %v85_v24 = vld [vmem:[%s2123_s3 + $0xa8] sm:$0xff] }
  0x19   :  { %1264 = vmatpush3.bf16.msra.mxu1 %v1263_v12  ;;  %v1235_v21 = vpack.c.bf16 %v67_v19, %v66_v18  ;;  %v99_v22 = vld [vmem:[%s2123_s3 + $0x118] sm:$0xff]  ;;  %1234 = vmatprep.subr.bf16.mxu0 %v1233_v16  ;;  %v1237_v26 = vpack.c.bf16 %v85_v24, %v84_v23  ;;  %v116_v27 = vld [vmem:[%s2123_s3 + $0x1a0] sm:$0xff]  ;;  %v117_v28 = vld [vmem:[%s2123_s3 + $0x1a8] sm:$0xff]  ;;  %p1451_p11 = por %p1450_p10, %p1449_p9 }
  0x1a   :  { %1266 = vmatprep.subr.bf16.mxu1 %v1265_v17  ;;  %v1267_v25 = vpack.c.bf16 %v99_v22, %v98_v20  ;;  %v68_v29 = vld [vmem:[%s2123_s3 + $0x20] sm:$0xff]  ;;  %v1269_v30 = vpack.c.bf16 %v117_v28, %v116_v27  ;;  %v69_v31 = vld [vmem:[%s2123_s3 + $0x28] sm:$0xff]  ;;  %v86_v35 = vld [vmem:[%s2123_s3 + $0xb0] sm:$0xff] }
  0x1b   :  { %v100_v32 = vld [vmem:[%s2123_s3 + $0x120] sm:$0xff]  ;;  %v101_v33 = vld [vmem:[%s2123_s3 + $0x128] sm:$0xff]  ;;  %v1239_v34 = vpack.c.bf16 %v69_v31, %v68_v29  ;;  %v87_v36 = vld [vmem:[%s2123_s3 + $0xb8] sm:$0xff]  ;;  %p1452_p12 = pnand %p1451_p11, %p1445_p8 }
  0x1c   :  { %1236 = vmatpush3.bf16.msra.mxu0 %v1235_v21  ;;  %v118_v37 = vld [vmem:[%s2123_s3 + $0x1b0] sm:$0xff]  ;;  %v1271_v38 = vpack.c.bf16 %v101_v33, %v100_v32  ;;  %v1241_v39 = vpack.c.bf16 %v87_v36, %v86_v35  ;;  %v119_v40 = vld [vmem:[%s2123_s3 + $0x1b8] sm:$0xff]  ;;  %v88_v46 = vld [vmem:[%s2123_s3 + $0xc0] sm:$0xff] }
  0x1d   :  { %1268 = vmatpush3.bf16.msra.mxu1 %v1267_v25  ;;  %1238 = vmatprep.subr.bf16.mxu0 %v1237_v26  ;;  %v70_v41 = vld [vmem:[%s2123_s3 + $0x30] sm:$0xff]  ;;  %v71_v42 = vld [vmem:[%s2123_s3 + $0x38] sm:$0xff]  ;;  %v1273_v43 = vpack.c.bf16 %v119_v40, %v118_v37  ;;  %v89_v47 = vld [vmem:[%s2123_s3 + $0xc8] sm:$0xff] }
  0x1e   :  { %1270 = vmatprep.subr.bf16.mxu1 %v1269_v30  ;;  %v102_v44 = vld [vmem:[%s2123_s3 + $0x130] sm:$0xff]  ;;  %v103_v45 = vld [vmem:[%s2123_s3 + $0x138] sm:$0xff]  ;;  %v120_v48 = vld [vmem:[%s2123_s3 + $0x1c0] sm:$0xff]  ;;  %v1243_v50 = vpack.c.bf16 %v71_v42, %v70_v41  ;;  %v1245_v52 = vpack.c.bf16 %v89_v47, %v88_v46 }
  0x1f   :  { %v121_v49 = vld [vmem:[%s2123_s3 + $0x1c8] sm:$0xff]  ;;  %v1275_v51 = vpack.c.bf16 %v103_v45, %v102_v44  ;;  %v72_v53 = vld [vmem:[%s2123_s3 + $0x40] sm:$0xff]  ;;  %v90_v58 = vld [vmem:[%s2123_s3 + $0xd0] sm:$0xff] }
  0x20   :  { %1240 = vmatpush3.bf16.msra.mxu0 %v1239_v34  ;;  %v73_v54 = vld [vmem:[%s2123_s3 + $0x48] sm:$0xff]  ;;  %v104_v55 = vld [vmem:[%s2123_s3 + $0x140] sm:$0xff]  ;;  %v1277_v56 = vpack.c.bf16 %v121_v49, %v120_v48  ;;  %v91_v59 = vld [vmem:[%s2123_s3 + $0xd8] sm:$0xff] }
  0x21   :  { %1272 = vmatpush3.bf16.msra.mxu1 %v1271_v38  ;;  %1242 = vmatprep.subr.bf16.mxu0 %v1241_v39  ;;  %v105_v57 = vld [vmem:[%s2123_s3 + $0x148] sm:$0xff]  ;;  %v122_v60 = vld [vmem:[%s2123_s3 + $0x1d0] sm:$0xff]  ;;  %v123_v61 = vld [vmem:[%s2123_s3 + $0x1d8] sm:$0xff]  ;;  %v1247_v62 = vpack.c.bf16 %v73_v54, %v72_v53  ;;  %v1249_v0 = vpack.c.bf16 %v91_v59, %v90_v58 }
  0x22   :  { %1274 = vmatprep.subr.bf16.mxu1 %v1273_v43  ;;  %v1279_v63 = vpack.c.bf16 %v105_v57, %v104_v55  ;;  %v74_v1 = vld [vmem:[%s2123_s3 + $0x50] sm:$0xff]  ;;  %v75_v2 = vld [vmem:[%s2123_s3 + $0x58] sm:$0xff]  ;;  %v1281_v4 = vpack.c.bf16 %v123_v61, %v122_v60  ;;  %v92_v6 = vld [vmem:[%s2123_s3 + $0xe0] sm:$0xff] }
  0x23   :  { %v106_v3 = vld [vmem:[%s2123_s3 + $0x150] sm:$0xff]  ;;  %v107_v5 = vld [vmem:[%s2123_s3 + $0x158] sm:$0xff]  ;;  %v93_v7 = vld [vmem:[%s2123_s3 + $0xe8] sm:$0xff]  ;;  %v1251_v10 = vpack.c.bf16 %v75_v2, %v74_v1 }
  0x24   :  { %1244 = vmatpush3.bf16.msra.mxu0 %v1243_v50  ;;  %v124_v8 = vld [vmem:[%s2123_s3 + $0x1e0] sm:$0xff]  ;;  %v125_v9 = vld [vmem:[%s2123_s3 + $0x1e8] sm:$0xff]  ;;  %v1283_v13 = vpack.c.bf16 %v107_v5, %v106_v3  ;;  %v1253_v14 = vpack.c.bf16 %v93_v7, %v92_v6  ;;  %v1718_v17 = vld [vmem:[%s2121_s1 + $0x18] sm:$0xff] }
  0x25   :  { %1276 = vmatpush3.bf16.msra.mxu1 %v1275_v51  ;;  %1246 = vmatprep.subr.bf16.mxu0 %v1245_v52  ;;  %v76_v11 = vld [vmem:[%s2123_s3 + $0x60] sm:$0xff]  ;;  %v77_v12 = vld [vmem:[%s2123_s3 + $0x68] sm:$0xff]  ;;  %v1285_v18 = vpack.c.bf16 %v125_v9, %v124_v8  ;;  %v94_v20 = vld [vmem:[%s2123_s3 + $0xf0] sm:$0xff] }
  0x26   :  { %1278 = vmatprep.subr.bf16.mxu1 %v1277_v56  ;;  %v108_v15 = vld [vmem:[%s2123_s3 + $0x160] sm:$0xff]  ;;  %v1713_v16 = vld [vmem:[%s2121_s1 + $0x8] sm:$0xff]  ;;  %v95_v21 = vld [vmem:[%s2123_s3 + $0xf8] sm:$0xff]  ;;  %267 = vmatprep.mubr.f32.mxu1 %v1718_v17  ;;  %v1255_v24 = vpack.c.bf16 %v77_v12, %v76_v11 }
  0x27   :  { %v109_v19 = vld [vmem:[%s2123_s3 + $0x168] sm:$0xff]  ;;  %192 = vmatprep.mubr.f32.mxu0 %v1713_v16  ;;  %v126_v22 = vld [vmem:[%s2123_s3 + $0x1f0] sm:$0xff]  ;;  %v127_v23 = vld [vmem:[%s2123_s3 + $0x1f8] sm:$0xff]  ;;  %v1257_v26 = vpack.c.bf16 %v95_v21, %v94_v20 }
  0x28   :  { %1248 = vmatpush3.bf16.msra.mxu0 %v1247_v62  ;;  %v1287_v25 = vpack.c.bf16 %v109_v19, %v108_v15  ;;  %v78_v27 = vld [vmem:[%s2123_s3 + $0x70] sm:$0xff]  ;;  %v79_v28 = vld [vmem:[%s2123_s3 + $0x78] sm:$0xff]  ;;  %v1289_v30 = vpack.c.bf16 %v127_v23, %v126_v22  ;;  %v60_v32 = vld [vmem:[%s2122_s2] sm:$0xff] }
  0x29   :  { %1280 = vmatpush3.bf16.msra.mxu1 %v1279_v63  ;;  %1250 = vmatprep.subr.bf16.mxu0 %v1249_v0  ;;  %v110_v29 = vld [vmem:[%s2123_s3 + $0x170] sm:$0xff]  ;;  %v111_v31 = vld [vmem:[%s2123_s3 + $0x178] sm:$0xff]  ;;  %v61_v33 = vld [vmem:[%s2122_s2 + $0x8] sm:$0xff]  ;;  %v1259_v36 = vpack.c.bf16 %v79_v28, %v78_v27 }
  0x2a   :  { %1282 = vmatprep.subr.bf16.mxu1 %v1281_v4  ;;  %v371_v34 = vld [vmem:[%s2125_s5] sm:$0xff]  ;;  %v372_v35 = vld [vmem:[%s2125_s5 + $0x8] sm:$0xff]  ;;  %v1291_v37 = vpack.c.bf16 %v111_v31, %v110_v29  ;;  %v1293_v38 = vpack.c.bf16 %v61_v33, %v60_v32  ;;  %v62_v40 = vld [vmem:[%s2122_s2 + $0x10] sm:$0xff] }
  0x2b   :  { %v1301_v39 = vpack.c.bf16 %v372_v35, %v371_v34  ;;  %v63_v41 = vld [vmem:[%s2122_s2 + $0x18] sm:$0xff]  ;;  %v1770_v42 = vld [vmem:[%s2121_s1] sm:$0xff]  ;;  %v373_v43 = vld [vmem:[%s2125_s5 + $0x10] sm:$0xff] }
  0x2c   :  { %1252 = vmatpush3.bf16.msra.mxu0 %v1251_v10  ;;  %v374_v44 = vld [vmem:[%s2125_s5 + $0x18] sm:$0xff]  ;;  %v1781_v45 = vld [vmem:[%s2121_s1 + $0x10] sm:$0xff]  ;;  %v1786_v46 = vld [vmem:[%s2121_s1 + $0x28] sm:$0xff]  ;;  %v1297_v48 = vpack.c.bf16 %v63_v41, %v62_v40 }
  0x2d   :  { %1284 = vmatpush3.bf16.msra.mxu1 %v1283_v13  ;;  %1254 = vmatprep.subr.bf16.mxu0 %v1253_v14  ;;  %v1791_v47 = vld [vmem:[%s2121_s1 + $0x38] sm:$0xff]  ;;  %v1305_v49 = vpack.c.bf16 %v374_v44, %v373_v43  ;;  %v1798_v50 = vld [vmem:[%s2121_s1 + $0x20] sm:$0xff]  ;;  %v1805_v51 = vld [vmem:[%s2121_s1 + $0x30] sm:$0xff] }
  0x2e   :  { %1286 = vmatprep.subr.bf16.mxu1 %v1285_v18  ;;  %v1807_v52 = vld [vmem:[#allocation2] sm:$0xff]  ;;  %v1811_v53 = vld [vmem:[#allocation2 + $0x8] sm:$0xff]  ;;  %v377_v57 = vld [vmem:[%s2125_s5 + $0x30] sm:$0xff] }
  0x2f   :  { %v375_v54 = vld [vmem:[%s2125_s5 + $0x20] sm:$0xff]  ;;  %v376_v55 = vld [vmem:[%s2125_s5 + $0x28] sm:$0xff]  ;;  %v378_v58 = vld [vmem:[%s2125_s5 + $0x38] sm:$0xff] }
  0x30   :  { %1256 = vmatpush3.bf16.msra.mxu0 %v1255_v24  ;;  %v1309_v56 = vpack.c.bf16 %v376_v55, %v375_v54  ;;  %v1313_v59 = vpack.c.bf16 %v378_v58, %v377_v57  ;;  %v379_v60 = vld [vmem:[%s2125_s5 + $0x40] sm:$0xff]  ;;  %v380_v61 = vld [vmem:[%s2125_s5 + $0x48] sm:$0xff]  ;;  %v381_v63 = vld [vmem:[%s2125_s5 + $0x50] sm:$0xff]  ;;  %v1473_v57 = vmov 0.0  }
  0x31   :  { %1288 = vmatpush3.bf16.msra.mxu1 %v1287_v25  ;;  %1258 = vmatprep.subr.bf16.mxu0 %v1257_v26  ;;  %v1317_v62 = vpack.c.bf16 %v380_v61, %v379_v60  ;;  %v382_v0 = vld [vmem:[%s2125_s5 + $0x58] sm:$0xff]  ;;  %v383_v2 = vld [vmem:[%s2125_s5 + $0x60] sm:$0xff]  ;;  %v384_v3 = vld [vmem:[%s2125_s5 + $0x68] sm:$0xff] }
  0x32   :  { %1290 = vmatprep.subr.bf16.mxu1 %v1289_v30  ;;  %v1321_v1 = vpack.c.bf16 %v382_v0, %v381_v63  ;;  %v385_v4 = vld [vmem:[%s2125_s5 + $0x70] sm:$0xff]  ;;  %v1325_v5 = vpack.c.bf16 %v384_v3, %v383_v2  ;;  %v386_v6 = vld [vmem:[%s2125_s5 + $0x78] sm:$0xff]  ;;  %v982_v25 = vld [vmem:[%s2124_s4] ss:$0 sm:$0xff] }
  0x33   :  { %v1329_v7 = vpack.c.bf16 %v386_v6, %v385_v4  ;;  %v486_v55 = vld [vmem:[%s2126_s6 + $0x8] sm:$0xff]  ;;  %v488_v58 = vld [vmem:[%s2126_s6 + $0x18] sm:$0xff]  ;;  %v691_v4 = vld [vmem:[%s2127_s7 + $0x110] sm:$0xff] }
  0x34   :  { %1260 = vmatpush3.bf16.msra.mxu0 %v1259_v36  ;;  %v706_v60 = vld [vmem:[%s2127_s7 + $0x188] sm:$0xff]  ;;  %v708_v2 = vld [vmem:[%s2127_s7 + $0x198] sm:$0xff] }
  0x35   :  { %1292 = vmatpush3.bf16.msra.mxu1 %v1291_v37  ;;  %1294 = vmatprep.subr.bf16.mxu0 %v1293_v38  ;;  %v690_v63 = vld [vmem:[%s2127_s7 + $0x108] sm:$0xff] }
  0x36   :  { %1302 = vmatprep.subr.bf16.mxu1 %v1301_v39 }
  0x37   :  { %193 = vmatmul.mubr.f32.vlgmr.msra.gmra.mrb[0].mxu0 %v1770_v42 }
  0x38   :  { %268 = vmatmul.mubr.f32.vlgmr.msra.gmra.mrb[0].mxu1 %v1781_v45  ;;  %1296 = vmatpush3.bf16.msra.mxu0 %v1293_v38 }
  0x39   :  { %197 = vmatprep.mubr.f32.mxu0 %v1786_v46  ;;  %272 = vmatprep.mubr.f32.mxu1 %v1791_v47 }
  0x3a   :  { %1298 = vmatprep.subr.bf16.mxu0 %v1297_v48  ;;  %1304 = vmatpush3.bf16.msra.mxu1 %v1301_v39 }
  0x3b   :  { %198 = vmatmul.mubr.f32.gmra.mrb[2].mxu0 %v1798_v50  ;;  %1306 = vmatprep.subr.bf16.mxu1 %v1305_v49 }
  0x3c   :  { %273 = vmatmul.mubr.f32.gmra.mrb[2].mxu1 %v1805_v51  ;;  %1300 = vmatpush3.bf16.msra.mxu0 %v1297_v48 }
  0x3d   :  { %1180 = vmatprep.mubr.msk.f32.mxu0 %vm278_vm0, %v1807_v52  ;;  %495 = vmatprep.subr.mxu0 %v486_v55 }
  0x3e   :  { %1308 = vmatpush3.bf16.msra.mxu1 %v1305_v49 }
  0x3f   :  { %1181 = vmatmul.mubr.msk.f32.vlgmr.msra.gmra.mrb[4].mxu0 %vm278_vm0, %v1811_v53  ;;  %1310 = vmatprep.subr.bf16.mxu1 %v1309_v56 }
  0x40   :  { %559 = vmatprep.mubr.f32.mxu0 %v1473_v57 }
  0x42   :  { %1312 = vmatpush3.bf16.msra.mxu1 %v1309_v56  ;;  %v485_v56 = vld [vmem:[%s2126_s6] sm:$0xff] }
  0x43   :  { %1314 = vmatprep.subr.bf16.mxu1 %v1313_v59  ;;  %496 = vmatpush1.msra.mxu0 %v485_v56 }
  0x44   :  { %572 = vmatprep.subr.mxu0 %v488_v58  ;;  %v660_v58 = vld [vmem:[%s2127_s7 + $0x18] sm:$0xff] }
  0x46   :  { %1316 = vmatpush3.bf16.msra.mxu1 %v1313_v59  ;;  %v705_v59 = vld [vmem:[%s2127_s7 + $0x180] sm:$0xff] }
  0x47   :  { %1318 = vmatprep.subr.bf16.mxu1 %v1317_v62  ;;  %v1373_v61 = vpack.c.bf16 %v706_v60, %v705_v59  ;;  %v677_v59 = vld [vmem:[%s2127_s7 + $0xa0] sm:$0xff]  ;;  %v678_v60 = vld [vmem:[%s2127_s7 + $0xa8] sm:$0xff] }
  0x4a   :  { %1320 = vmatpush3.bf16.msra.mxu1 %v1317_v62  ;;  %v689_v62 = vld [vmem:[%s2127_s7 + $0x100] sm:$0xff] }
  0x4b   :  { %1322 = vmatprep.subr.bf16.mxu1 %v1321_v1  ;;  %v1375_v0 = vpack.c.bf16 %v690_v63, %v689_v62  ;;  %v661_v62 = vld [vmem:[%s2127_s7 + $0x20] sm:$0xff]  ;;  %v662_v63 = vld [vmem:[%s2127_s7 + $0x28] sm:$0xff] }
  0x4e   :  { %1324 = vmatpush3.bf16.msra.mxu1 %v1321_v1  ;;  %v707_v1 = vld [vmem:[%s2127_s7 + $0x190] sm:$0xff] }
  0x4f   :  { %1326 = vmatprep.subr.bf16.mxu1 %v1325_v5  ;;  %v1377_v3 = vpack.c.bf16 %v708_v2, %v707_v1  ;;  %v1351_v1 = vpack.c.bf16 %v662_v63, %v661_v62 }
  0x52   :  { %1328 = vmatpush3.bf16.msra.mxu1 %v1325_v5  ;;  %v692_v5 = vld [vmem:[%s2127_s7 + $0x118] sm:$0xff] }
  0x53   :  { %1330 = vmatprep.subr.bf16.mxu1 %v1329_v7  ;;  %v1379_v6 = vpack.c.bf16 %v692_v5, %v691_v4  ;;  %v664_v4 = vld [vmem:[%s2127_s7 + $0x38] sm:$0xff]  ;;  %v681_v5 = vld [vmem:[%s2127_s7 + $0xc0] sm:$0xff] }
  0x56   :  { %1332 = vmatpush3.bf16.msra.mxu1 %v1329_v7  ;;  %v709_v7 = vld [vmem:[%s2127_s7 + $0x1a0] sm:$0xff] }
  0x57   :  { %1374 = vmatprep.subr.bf16.mxu1 %v1373_v61  ;;  %v1349_v61 = vpack.c.bf16 %v678_v60, %v677_v59 }
 0x10a   :  { %v1022_v8 = vpop.f32.mrb[0].mxu0 }
 0x10b   :  { %v1060_v9 = vpop.f32.mrb[0].mxu1  ;;  %v1023_v10 = vpop.f32.mrb[1].mxu0 }
 0x10c   :  { %v1024_v11 = vadd.f32 %v1023_v10, %v1022_v8  ;;  %v1061_v12 = vpop.f32.mrb[1].mxu1  ;;  %v710_v8 = vld [vmem:[%s2127_s7 + $0x1a8] sm:$0xff]  ;;  %v693_v10 = vld [vmem:[%s2127_s7 + $0x120] sm:$0xff] }
 0x10d   :  { %v1062_v13 = vadd.f32 %v1061_v12, %v1060_v9  ;;  %v1381_v9 = vpack.c.bf16 %v710_v8, %v709_v7 }
 0x10e   :  { %v1025_v14 = vpop.f32.mrb[2].mxu0 }
 0x10f   :  { %v1063_v15 = vpop.f32.mrb[2].mxu1  ;;  %v1026_v18 = vpop.f32.mrb[3].mxu0  ;;  %v270_v19 = vadd.f32 %v1062_v13, %v1024_v11  ;;  %v694_v11 = vld [vmem:[%s2127_s7 + $0x128] sm:$0xff]  ;;  %v711_v13 = vld [vmem:[%s2127_s7 + $0x1b0] sm:$0xff] }
 0x110   :  { %v1027_v20 = vadd.f32 %v1026_v18, %v1025_v14  ;;  %v1064_v21 = vpop.f32.mrb[3].mxu1  ;;  %v1383_v12 = vpack.c.bf16 %v694_v11, %v693_v10  ;;  %v712_v14 = vld [vmem:[%s2127_s7 + $0x1b8] sm:$0xff]  ;;  %v695_v18 = vld [vmem:[%s2127_s7 + $0x130] sm:$0xff]  ;;  %v666_v10 = vld [vmem:[%s2127_s7 + $0x48] sm:$0xff] }
 0x111   :  { %v1065_v22 = vadd.f32 %v1064_v21, %v1063_v15  ;;  %v1385_v15 = vpack.c.bf16 %v712_v14, %v711_v13  ;;  %v713_v21 = vld [vmem:[%s2127_s7 + $0x1c0] sm:$0xff]  ;;  %v683_v11 = vld [vmem:[%s2127_s7 + $0xd0] sm:$0xff] }
 0x112   :  { %v1182_v23 = vpop.f32.mrb[4].mxu0 }
 0x113   :  { %v275_v24 = vadd.f32 %v1065_v22, %v1027_v20  ;;  %v351_v26 = vpop.f32.mrb[5].mxu0  ;;  %v714_v22 = vld [vmem:[%s2127_s7 + $0x1c8] sm:$0xff] }
 0x114   :  { %v352_v27 = vadd.f32 %v351_v26, %v270_v19  ;;  %v696_v19 = vld [vmem:[%s2127_s7 + $0x138] sm:$0xff] }
 0x115   :  { %v357_v28 = vadd.f32 %v1182_v23, %v275_v24  ;;  %v1387_v20 = vpack.c.bf16 %v696_v19, %v695_v18  ;;  %v1389_v23 = vpack.c.bf16 %v714_v22, %v713_v21  ;;  %v697_v24 = vld [vmem:[%s2127_s7 + $0x140] sm:$0xff]  ;;  %v668_v18 = vld [vmem:[%s2127_s7 + $0x58] sm:$0xff] }
 0x116   :  { %v367_v29 = vadd.f32 %v982_v25, %v352_v27  ;;  %v685_v19 = vld [vmem:[%s2127_s7 + $0xe0] sm:$0xff] }
 0x117   :  { %v368_v30 = vadd.f32 %v982_v25, %v357_v28  ;;  %v698_v25 = vld [vmem:[%s2127_s7 + $0x148] sm:$0xff] }
 0x118   :  { %1410 = vtanh.f32 %v367_v29  ;;  %v1391_v26 = vpack.c.bf16 %v698_v25, %v697_v24  ;;  %v721_v29 = vld [vmem:[%s2128_s8] sm:$0xff]  ;;  %v670_v24 = vld [vmem:[%s2127_s7 + $0x68] sm:$0xff] }
 0x119   :  { %1412 = vtanh.f32 %v368_v30  ;;  %v722_v30 = vld [vmem:[%s2128_s8 + $0x8] sm:$0xff] }
 0x122   :  { %v1411_v31 = vpop.eup %1410 }
 0x123   :  { %v1413_v32 = vpop.eup %1412  ;;  %1215 = vmatprep.mubr.f32.mxu1 %v1411_v31 }
 0x124   :  { %1216 = vmatmul.mubr.f32.vlgmr.msra.gmra.mrb[4].mxu1 %v1413_v32 }
 0x125   :  { %1376 = vmatpush3.bf16.msra.mxu1 %v1375_v0  ;;  %v679_v0 = vld [vmem:[%s2127_s7 + $0xb0] sm:$0xff] }
 0x126   :  { %1378 = vmatprep.subr.bf16.mxu1 %v1377_v3  ;;  %v663_v3 = vld [vmem:[%s2127_s7 + $0x30] sm:$0xff] }
 0x127   :  { %v1355_v7 = vpack.c.bf16 %v664_v4, %v663_v3 }
 0x129   :  { %1380 = vmatpush3.bf16.msra.mxu1 %v1379_v6  ;;  %v682_v6 = vld [vmem:[%s2127_s7 + $0xc8] sm:$0xff] }
 0x12a   :  { %1382 = vmatprep.subr.bf16.mxu1 %v1381_v9  ;;  %v1357_v8 = vpack.c.bf16 %v682_v6, %v681_v5  ;;  %v665_v9 = vld [vmem:[%s2127_s7 + $0x40] sm:$0xff] }
 0x12b   :  { %v1359_v13 = vpack.c.bf16 %v666_v10, %v665_v9 }
 0x12d   :  { %1384 = vmatpush3.bf16.msra.mxu1 %v1383_v12  ;;  %v684_v12 = vld [vmem:[%s2127_s7 + $0xd8] sm:$0xff] }
 0x12e   :  { %1386 = vmatprep.subr.bf16.mxu1 %v1385_v15  ;;  %v1361_v14 = vpack.c.bf16 %v684_v12, %v683_v11  ;;  %v667_v15 = vld [vmem:[%s2127_s7 + $0x50] sm:$0xff] }
 0x12f   :  { %v1363_v21 = vpack.c.bf16 %v668_v18, %v667_v15 }
 0x131   :  { %1388 = vmatpush3.bf16.msra.mxu1 %v1387_v20  ;;  %v686_v20 = vld [vmem:[%s2127_s7 + $0xe8] sm:$0xff] }
 0x132   :  { %1390 = vmatprep.subr.bf16.mxu1 %v1389_v23  ;;  %v1365_v22 = vpack.c.bf16 %v686_v20, %v685_v19  ;;  %v669_v23 = vld [vmem:[%s2127_s7 + $0x60] sm:$0xff] }
 0x133   :  { %v1367_v25 = vpack.c.bf16 %v670_v24, %v669_v23 }
 0x135   :  { %1392 = vmatpush3.bf16.msra.mxu1 %v1391_v26  ;;  %v687_v26 = vld [vmem:[%s2127_s7 + $0xf0] sm:$0xff] }
 0x1f7   :  { %v1217_v33 = vpop.f32.mrb[4].mxu1 }
 0x1f8   :  { %v453_v34 = vpop.f32.mrb[5].mxu1  ;;  %v466_v36 = vsel %vm462_vm1, %v1217_v33, -inf }
 0x1f9   :  { %v463_v35 = vsel %vm462_vm1, %v453_v34, -inf }
 0x1fa   :  { %464 = vmax.xlane.f32.xlu0 %v463_v35 }
 0x1fe   :  { %467 = vmax.xlane.f32.xlu0 %v466_v36 }
 0x287   :  { %v465_v37 = vpop.xlane.xlu0 %464 }
 0x288   :  { %v469_v38 = vsub.f32 %v453_v34, %v465_v37  ;;  %v1333_v34 = vpack.c.bf16 %v722_v30, %v721_v29  ;;  %v723_v37 = vld [vmem:[%s2128_s8 + $0x10] sm:$0xff]  ;;  %v716_v30 = vld [vmem:[%s2127_s7 + $0x1d8] sm:$0xff] }
 0x28a   :  { %v471_v39 = vmul.f32 1.442695, %v469_v38  ;;  %v724_v38 = vld [vmem:[%s2128_s8 + $0x18] sm:$0xff] }
 0x28b   :  { %v468_v40 = vpop.xlane.xlu0 %467 }
 0x28c   :  { %1414 = vpow2.f32 %v471_v39  ;;  %v470_v41 = vsub.f32 %v1217_v33, %v468_v40  ;;  %v487_v33 = vld [vmem:[%s2126_s6 + $0x10] sm:$0xff]  ;;  %v1337_v39 = vpack.c.bf16 %v724_v38, %v723_v37  ;;  %v673_v40 = vld [vmem:[%s2127_s7 + $0x80] sm:$0xff] }
 0x28d   :  { %v717_v38 = vld [vmem:[%s2127_s7 + $0x1e0] sm:$0xff] }
 0x28e   :  { %v473_v43 = vmul.f32 1.442695, %v470_v41  ;;  %v674_v41 = vld [vmem:[%s2127_s7 + $0x88] sm:$0xff] }
 0x290   :  { %1416 = vpow2.f32 %v473_v43  ;;  %v1341_v43 = vpack.c.bf16 %v674_v41, %v673_v40  ;;  %v701_v41 = vld [vmem:[%s2127_s7 + $0x160] sm:$0xff] }
 0x296   :  { %v1415_v44 = vpop.eup %1414 }
 0x297   :  { %v475_v48 = vsel %vm462_vm1, %v1415_v44, 0.0 }
 0x298   :  { %476 = vadd.xlane.f32.xlu1 %v475_v48  ;;  %v658_v48 = vld [vmem:[%s2127_s7 + $0x8] sm:$0xff] }
 0x29a   :  { %v1859_v49 = vpop.eup %1416 }
 0x29b   :  { %v478_v54 = vsel %vm462_vm1, %v1859_v49, 0.0 }
 0x29c   :  { %479 = vadd.xlane.f32.xlu1 %v478_v54  ;;  %v676_v54 = vld [vmem:[%s2127_s7 + $0x98] sm:$0xff] }
 0x325   :  { %v477_v27 = vpop.xlane.xlu1 %476 }
 0x326   :  { %1418 = vrcp.f32 %v477_v27  ;;  %v688_v27 = vld [vmem:[%s2127_s7 + $0xf8] sm:$0xff] }
 0x327   :  { %v1369_v29 = vpack.c.bf16 %v688_v27, %v687_v26 }
 0x329   :  { %v480_v28 = vpop.xlane.xlu1 %479 }
 0x32a   :  { %1420 = vrcp.f32 %v480_v28  ;;  %v715_v28 = vld [vmem:[%s2127_s7 + $0x1d0] sm:$0xff] }
 0x330   :  { %v1419_v31 = vpop.eup %1418 }
 0x331   :  { %v483_v32 = vmul.f32 %v1419_v31, %v1415_v44  ;;  %v657_v44 = vld [vmem:[%s2127_s7] sm:$0xff]  ;;  %v671_v31 = vld [vmem:[%s2127_s7 + $0x70] sm:$0xff] }
 0x332   :  { %v1343_v55 = vpack.c.bf16 %v658_v48, %v657_v44  ;;  %v719_v48 = vld [vmem:[%s2127_s7 + $0x1f0] sm:$0xff] }
 0x333   :  { %983 = vmatmul.mubr.msk.f32.vlgmr.msra.gmra.mrb[6].mxu0 %vm462_vm1, %v483_v32 }
 0x334   :  { %v1421_v35 = vpop.eup %1420  ;;  %573 = vmatpush1.msra.mxu0 %v487_v33  ;;  %565 = vmatprep.mubr.f32.mxu0 %v1473_v57  ;;  %v1393_v33 = vpack.c.bf16 %v716_v30, %v715_v28 }
 0x335   :  { %v484_v36 = vmul.f32 %v1421_v35, %v1859_v49  ;;  %1334 = vmatprep.subr.bf16.mxu0 %v1333_v34  ;;  %v675_v49 = vld [vmem:[%s2127_s7 + $0x90] sm:$0xff] }
 0x336   :  { %v1345_v56 = vpack.c.bf16 %v676_v54, %v675_v49  ;;  %v699_v35 = vld [vmem:[%s2127_s7 + $0x150] sm:$0xff]  ;;  %1394 = vmatprep.subr.bf16.mxu1 %v1393_v33  ;;  %v720_v49 = vld [vmem:[%s2127_s7 + $0x1f8] sm:$0xff] }
 0x337   :  { %984 = vmatmul.mubr.msk.f32.gmra.mrb[8].mxu0 %vm462_vm1, %v484_v36  ;;  %v1401_v54 = vpack.c.bf16 %v720_v49, %v719_v48 }
 0x338   :  { %636 = vmatprep.mubr.f32.mxu0 %v1473_v57 }
 0x33b   :  { %985 = vmatmul.mubr.msk.f32.vlgmr.msra.gmra.mrb[10].mxu0 %vm462_vm1, %v483_v32  ;;  %v672_v32 = vld [vmem:[%s2127_s7 + $0x78] sm:$0xff] }
 0x33c   :  { %642 = vmatprep.mubr.f32.mxu0 %v1473_v57  ;;  %1336 = vmatpush3.bf16.msra.mxu0 %v1333_v34  ;;  %v659_v57 = vld [vmem:[%s2127_s7 + $0x10] sm:$0xff]  ;;  %v1371_v34 = vpack.c.bf16 %v672_v32, %v671_v31 }
 0x33d   :  { %1338 = vmatprep.subr.bf16.mxu0 %v1337_v39 }
 0x33f   :  { %986 = vmatmul.mubr.msk.f32.gmra.mrb[12].mxu0 %vm462_vm1, %v484_v36  ;;  %v700_v36 = vld [vmem:[%s2127_s7 + $0x158] sm:$0xff] }
 0x340   :  { %1340 = vmatpush3.bf16.msra.mxu0 %v1337_v39  ;;  %1226 = vmatprep.mubr.msk.f32.mxu0 %vm278_vm0, %v1807_v52  ;;  %v1347_v52 = vpack.c.bf16 %v660_v58, %v659_v57  ;;  %v1395_v37 = vpack.c.bf16 %v700_v36, %v699_v35  ;;  %v718_v39 = vld [vmem:[%s2127_s7 + $0x1e8] sm:$0xff] }
 0x341   :  { %1342 = vmatprep.subr.bf16.mxu0 %v1341_v43  ;;  %v1397_v40 = vpack.c.bf16 %v718_v39, %v717_v38  ;;  %v702_v43 = vld [vmem:[%s2127_s7 + $0x168] sm:$0xff] }
 0x342   :  { %1396 = vmatpush3.bf16.msra.mxu1 %v1395_v37  ;;  %v1399_v44 = vpack.c.bf16 %v702_v43, %v701_v41 }
 0x343   :  { %1227 = vmatmul.mubr.msk.f32.vlgmr.msra.gmra.mrb[14].mxu0 %vm278_vm0, %v1811_v53  ;;  %v680_v53 = vld [vmem:[%s2127_s7 + $0xb8] sm:$0xff]  ;;  %1398 = vmatprep.subr.bf16.mxu1 %v1397_v40 }
 0x344   :  { %1344 = vmatpush3.bf16.msra.mxu0 %v1343_v55  ;;  %v1353_v2 = vpack.c.bf16 %v680_v53, %v679_v0  ;;  %v703_v55 = vld [vmem:[%s2127_s7 + $0x170] sm:$0xff] }
 0x345   :  { %1346 = vmatprep.subr.bf16.mxu0 %v1345_v56  ;;  %v704_v56 = vld [vmem:[%s2127_s7 + $0x178] sm:$0xff] }
 0x346   :  { %1400 = vmatpush3.bf16.msra.mxu1 %v1399_v44  ;;  %v1403_v57 = vpack.c.bf16 %v704_v56, %v703_v55 }
 0x347   :  { %1402 = vmatprep.subr.bf16.mxu1 %v1401_v54 }
 0x348   :  { %1348 = vmatpush3.bf16.msra.mxu0 %v1347_v52 }
 0x349   :  { %1350 = vmatprep.subr.bf16.mxu0 %v1349_v61 }
 0x34a   :  { %1404 = vmatpush3.bf16.msra.mxu1 %v1403_v57 }
 0x34c   :  { %1352 = vmatpush3.bf16.msra.mxu0 %v1351_v1 }
 0x34d   :  { %1354 = vmatprep.subr.bf16.mxu0 %v1353_v2 }
 0x350   :  { %1356 = vmatpush3.bf16.msra.mxu0 %v1355_v7 }
 0x351   :  { %1358 = vmatprep.subr.bf16.mxu0 %v1357_v8 }
 0x354   :  { %1360 = vmatpush3.bf16.msra.mxu0 %v1359_v13 }
 0x355   :  { %1362 = vmatprep.subr.bf16.mxu0 %v1361_v14 }
 0x358   :  { %1364 = vmatpush3.bf16.msra.mxu0 %v1363_v21 }
 0x359   :  { %1366 = vmatprep.subr.bf16.mxu0 %v1365_v22 }
 0x35c   :  { %1368 = vmatpush3.bf16.msra.mxu0 %v1367_v25 }
 0x35d   :  { %1370 = vmatprep.subr.bf16.mxu0 %v1369_v29 }
 0x360   :  { %1372 = vmatpush3.bf16.msra.mxu0 %v1371_v34 }
 0x406   :  { %v561_v58 = vpop.f32.mrb[6].mxu0 }
 0x407   :  { %v563_v59 = vpop.f32.mrb[7].mxu0  ;;  %v649_v52 = vmul.f32 %v561_v58, %v1770_v42 }
 0x408   :  { %v650_v60 = vmul.f32 %v563_v59, %v1713_v16 }
 0x40a   :  { %v567_v61 = vpop.f32.mrb[8].mxu0  ;;  %864 = vmatprep.mubr.f32.mxu0 %v650_v60 }
 0x40b   :  { %v569_v62 = vpop.f32.mrb[9].mxu0  ;;  %865 = vmatmul.mubr.f32.vlgmr.msra.gmra.mrb[16].mxu0 %v649_v52  ;;  %v653_v0 = vmul.f32 %v567_v61, %v1798_v50 }
 0x40c   :  { %v654_v63 = vmul.f32 %v569_v62, %v1786_v46 }
 0x40e   :  { %v638_v53 = vpop.f32.mrb[10].mxu0  ;;  %869 = vmatprep.mubr.f32.mxu0 %v654_v63 }
 0x40f   :  { %v640_v1 = vpop.f32.mrb[11].mxu0  ;;  %870 = vmatmul.mubr.f32.gmra.mrb[18].mxu0 %v653_v0  ;;  %v651_v3 = vmul.f32 %v638_v53, %v1781_v45 }
 0x410   :  { %v652_v2 = vmul.f32 %v640_v1, %v1718_v17 }
 0x412   :  { %v644_v4 = vpop.f32.mrb[12].mxu0  ;;  %939 = vmatprep.mubr.f32.mxu1 %v652_v2 }
 0x413   :  { %v646_v16 = vpop.f32.mrb[13].mxu0  ;;  %940 = vmatmul.mubr.f32.vlgmr.msra.gmra.mrb[6].mxu1 %v651_v3  ;;  %v655_v5 = vmul.f32 %v644_v4, %v1805_v51 }
 0x414   :  { %v656_v42 = vmul.f32 %v646_v16, %v1791_v47  ;;  %v989_v47 = vld [vmem:[%s2129_s9] ss:$0 sm:$0xff] }
 0x416   :  { %944 = vmatprep.mubr.f32.mxu1 %v656_v42  ;;  %v1228_v46 = vpop.f32.mrb[14].mxu0 }
 0x417   :  { %945 = vmatmul.mubr.f32.gmra.mrb[8].mxu1 %v655_v5  ;;  %v791_v50 = vpop.f32.mrb[15].mxu0 }
 0x4de   :  { %v1128_v6 = vpop.f32.mrb[16].mxu0 }
 0x4df   :  { %v1129_v7 = vpop.f32.mrb[17].mxu0 }
 0x4e0   :  { %v1130_v8 = vadd.f32 %v1129_v7, %v1128_v6 }
 0x4e2   :  { %v867_v9 = vadd.f32 %v1130_v8, %v791_v50  ;;  %v1131_v10 = vpop.f32.mrb[18].mxu0 }
 0x4e3   :  { %v1132_v17 = vpop.f32.mrb[19].mxu0 }
 0x4e4   :  { %v1133_v11 = vadd.f32 %v1132_v17, %v1131_v10 }
 0x4e6   :  { %v872_v45 = vadd.f32 %v1228_v46, %v1133_v11  ;;  %v1166_v12 = vpop.f32.mrb[6].mxu1 }
 0x4e7   :  { %v1167_v13 = vpop.f32.mrb[7].mxu1 }
 0x4e8   :  { %v1168_v14 = vadd.f32 %v1167_v13, %v1166_v12 }
 0x4ea   :  { %v942_v51 = vadd.f32 %v1168_v14, %v867_v9  ;;  %v1169_v15 = vpop.f32.mrb[8].mxu1 }
 0x4eb   :  { %v1170_v18 = vpop.f32.mrb[9].mxu1 }
 0x4ec   :  { %v957_v19 = vadd.f32 %v989_v47, %v942_v51  ;;  %v1171_v20 = vadd.f32 %v1170_v18, %v1169_v15 }
 0x4ee   :  { %v959_v21 = vmax.f32 %v957_v19, 0.0  ;;  %v947_v22 = vadd.f32 %v1171_v20, %v872_v45 }
 0x4f0   :  { %961 = vst.msk [vmem:[#allocation5] sm:$0xff] %vm278_vm0, %v959_v21  ;;  %v958_v23 = vadd.f32 %v989_v47, %v947_v22 }
 0x4f2   :  { %v960_v24 = vmax.f32 %v958_v23, 0.0 }
 0x4f4   :  { %962 = vst.msk [vmem:[#allocation5 + $0x8] sm:$0xff] %vm278_vm0, %v960_v24 }
 0x4f5   :  { %1455 = shalt.err (!%p1452_p12)
}
 0x4f6   :  { %s1456_s13 = scalar_lea.hbm %s2130_s10, 256 }
 0x4f7   :  { %p1457_p13 = scmp.ne.s32.totalorder %s2130_s10, %s1456_s13  ;;  %p1460_p0 = scmp.lt.u32.totalorder %s1456_s13, %s2130_s10 }
 0x4f9   :  { %p1462_p1 = pnand %p1460_p0, %p1457_p13 }
 0x4fb   :  { %1465 = shalt.err (!%p1462_p1)
}
 0x4fc   :  { %974 = dma.vmem_to_hbm [thread:$0]  %s969_s11, 256, %s2130_s10, [#allocation4], %s1471_s23, %s1471_s23, %s1472_s24  }
 0x4fd   :  { %1468 = dma.done.wait [#allocation4], 256  }
 0x4fe   :  { %1469 = vsyncadd [#allocation4], 4294967040 }
 0x4ff   :  { %978 = vsyncpa [#allocation3], 1 }
 0x500   :  { %979 = vsyncpa [#allocation4], 1 }

</bundles_post_ra>
